<compile_context>
chip_gen: v7x
topology: tpu7x:2x2x1
jax: 0.10.0
libtpu: 0.0.40
codegen_flags: <defaults>
</compile_context>

<pallas_src>
import jax
import jax.numpy as jnp
from jax import lax
from jax.experimental import pallas as pl
from jax.experimental.pallas import tpu as pltpu

INPUT_DIM = 28
HIDDEN_DIM = 64
OUT_PAD = 128  # lane-dense padded decoder output width (>= INPUT_DIM)


def _vmem():
    return pl.BlockSpec(memory_space=pltpu.MemorySpace.VMEM)


# ---------------------------------------------------------------------------
# Fused kernel: encoder + reparameterize + edge gather + decoder
# ---------------------------------------------------------------------------
def gvae_fused_kernel(a_ref, x_ref, src_ref, dst_ref,
                      wenc_ref, benc_ref, wmuls_ref, bmuls_ref, eps_ref,
                      wd1t_ref, wd1b_ref, bd1_ref, wd2_ref, bd2_ref,
                      muls_ref, z_ref, score_ref, recon_ref):
    n = a_ref.shape[0]
    e = src_ref.shape[0]

    # GCNConv, reordered as (A_norm @ X) @ W_enc + b  (== A_norm @ (X @ W_enc) + b).
    # bf16 operands into the MXU, f32 accumulation.
    ax = jnp.dot(a_ref[...], x_ref[...], preferred_element_type=jnp.float32)      # [N, 28]
    h = jnp.dot(ax, wenc_ref[...], preferred_element_type=jnp.float32) + benc_ref[...]
    h = jnp.maximum(h, 0.0)                                                        # F.relu

    # fc_mu and fc_logstd fused into a single lane-full [64, 128] matmul.
    muls = jnp.dot(h, wmuls_ref[...], preferred_element_type=jnp.float32) + bmuls_ref[...]
    muls_ref[...] = muls                                                           # mu || logstd
    mu = muls[:, :HIDDEN_DIM]
    logstd = muls[:, HIDDEN_DIM:]

    # Reparameterize: z = mu + eps * exp(0.5 * logstd)   (exp -> EUP slot).
    z = mu + eps_ref[...] * jnp.exp(0.5 * logstd)
    z_ref[...] = z

    # In-kernel edge-endpoint gather via one-hot selection matmuls (MXU work,
    # avoids dynamic-gather lowering and the XLA take/concat round trip).
    iota_n = lax.broadcasted_iota(jnp.int32, (e, n), 1)                            # [E, N]
    sel_src = jnp.where(src_ref[...] == iota_n, 1.0, 0.0).astype(jnp.float32)      # [E, N]
    sel_dst = jnp.where(dst_ref[...] == iota_n, 1.0, 0.0).astype(jnp.float32)      # [E, N]

    # Decoder layer 1 without the concat:
    #   cat(z_i, z_j) @ W1 == z_i @ W1_top + z_j @ W1_bot
    #                      == sel_src @ (z @ W1_top) + sel_dst @ (z @ W1_bot)
    zt = jnp.dot(z, wd1t_ref[...], preferred_element_type=jnp.float32)             # [N, 64]
    zb = jnp.dot(z, wd1b_ref[...], preferred_element_type=jnp.float32)             # [N, 64]
    hd = (jnp.dot(sel_src, zt, preferred_element_type=jnp.float32)
          + jnp.dot(sel_dst, zb, preferred_element_type=jnp.float32)
          + bd1_ref[...])
    hd = jnp.maximum(hd, 0.0)

    # Decoder layer 2 into a lane-dense padded [E, 128] output (cols >= 28 are
    # zero-weight).  Both output streams are full 128-lane stores.
    out = jnp.dot(hd, wd2_ref[...], preferred_element_type=jnp.float32) + bd2_ref[...]
    recon_ref[...] = out
    score_ref[...] = jax.nn.sigmoid(out)


# ---------------------------------------------------------------------------
# Glue: normalized adjacency, parameter init / packing, full forward
# ---------------------------------------------------------------------------
def gcn_norm_adj(edge_index, num_nodes):
    """A_norm = D^{-1/2} (A + I) D^{-1/2}, with A[target, source] = 1."""
    # TODO(synk): large graphs should keep edges sparse instead of a dense N x N A.
    src, dst = edge_index[0], edge_index[1]
    a = jnp.zeros((num_nodes, num_nodes), jnp.float32)
    a = a.at[dst, src].add(1.0)
    a = a + jnp.eye(num_nodes, dtype=jnp.float32)      # add self loops
    deg = jnp.sum(a, axis=1)
    d_inv_sqrt = jnp.where(deg > 0, 1.0 / jnp.sqrt(deg), 0.0)
    return d_inv_sqrt[:, None] * a * d_inv_sqrt[None, :]


def init_params(key):
    ks = jax.random.split(key, 10)

    def lin_w(kw, fan_in, fan_out):
        bound = 1.0 / jnp.sqrt(fan_in)
        return jax.random.uniform(kw, (fan_in, fan_out), jnp.float32, -bound, bound)

    def lin_b(kb, fan_in, fan_out):
        bound = 1.0 / jnp.sqrt(fan_in)
        return jax.random.uniform(kb, (1, fan_out), jnp.float32, -bound, bound)

    return {
        "w_enc": lin_w(ks[0], INPUT_DIM, HIDDEN_DIM),
        "b_enc": lin_b(ks[1], INPUT_DIM, HIDDEN_DIM),
        "w_mu": lin_w(ks[2], HIDDEN_DIM, HIDDEN_DIM),
        "b_mu": lin_b(ks[3], HIDDEN_DIM, HIDDEN_DIM),
        "w_logstd": lin_w(ks[4], HIDDEN_DIM, HIDDEN_DIM),
        "b_logstd": lin_b(ks[5], HIDDEN_DIM, HIDDEN_DIM),
        "w_dec1": lin_w(ks[6], 2 * HIDDEN_DIM, HIDDEN_DIM),
        "b_dec1": lin_b(ks[7], 2 * HIDDEN_DIM, HIDDEN_DIM),
        "w_dec2": lin_w(ks[8], HIDDEN_DIM, INPUT_DIM),
        "b_dec2": lin_b(ks[9], HIDDEN_DIM, INPUT_DIM),
    }


def pack_params(p):
    """Pack raw params into the fused / lane-dense layouts the kernel expects."""
    w_dec2_pad = jnp.zeros((HIDDEN_DIM, OUT_PAD), jnp.float32).at[:, :INPUT_DIM].set(p["w_dec2"])
    b_dec2_pad = jnp.zeros((1, OUT_PAD), jnp.float32).at[:, :INPUT_DIM].set(p["b_dec2"])
    return {
        "w_enc": p["w_enc"],
        "b_enc": p["b_enc"],
        "w_muls": jnp.concatenate([p["w_mu"], p["w_logstd"]], axis=1),      # [64, 128]
        "b_muls": jnp.concatenate([p["b_mu"], p["b_logstd"]], axis=1),      # [1, 128]
        "w_dec1_top": p["w_dec1"][:HIDDEN_DIM],                             # [64, 64]
        "w_dec1_bot": p["w_dec1"][HIDDEN_DIM:],                             # [64, 64]
        "b_dec1": p["b_dec1"],                                              # [1, 64]
        "w_dec2_pad": w_dec2_pad,                                           # [64, 128]
        "b_dec2_pad": b_dec2_pad,                                           # [1, 128]
    }


def gvae_forward(x, edge_index, packed, eps):
    n = x.shape[0]
    e = edge_index.shape[1]

    a_norm = gcn_norm_adj(edge_index, n).astype(jnp.bfloat16)   # bf16 MXU operand
    x_bf16 = x.astype(jnp.bfloat16)
    src = edge_index[0].astype(jnp.int32).reshape(e, 1)
    dst = edge_index[1].astype(jnp.int32).reshape(e, 1)

    flops = int(2 * (n * n * INPUT_DIM
                     + n * INPUT_DIM * HIDDEN_DIM
                     + n * HIDDEN_DIM * 2 * HIDDEN_DIM
                     + 2 * n * HIDDEN_DIM * HIDDEN_DIM
                     + 2 * e * n * HIDDEN_DIM
                     + e * HIDDEN_DIM * OUT_PAD))
    transcendentals = int(n * HIDDEN_DIM + e * OUT_PAD)
    bytes_accessed = int(a_norm.size * 2 + x_bf16.size * 2 + eps.size * 4
                         + 2 * e * 4
                         + sum(int(v.size) * 4 for v in packed.values())
                         + (n * 2 * HIDDEN_DIM + n * HIDDEN_DIM + 2 * e * OUT_PAD) * 4)

    out_shape = (
        jax.ShapeDtypeStruct((n, 2 * HIDDEN_DIM), jnp.float32),   # mu || logstd
        jax.ShapeDtypeStruct((n, HIDDEN_DIM), jnp.float32),       # z
        jax.ShapeDtypeStruct((e, OUT_PAD), jnp.float32),          # sigmoid(decoder), padded
        jax.ShapeDtypeStruct((e, OUT_PAD), jnp.float32),          # decoder output, padded
    )

    muls, _z, score_pad, recon_pad = pl.pallas_call(
        gvae_fused_kernel,
        out_shape=out_shape,
        in_specs=[_vmem()] * 14,
        out_specs=(_vmem(), _vmem(), _vmem(), _vmem()),
        compiler_params=pltpu.CompilerParams(vmem_limit_bytes=32 * 1024 * 1024),
        cost_estimate=pl.CostEstimate(flops=flops,
                                      transcendentals=transcendentals,
                                      bytes_accessed=bytes_accessed),
    )(a_norm, x_bf16, src, dst,
      packed["w_enc"], packed["b_enc"], packed["w_muls"], packed["b_muls"], eps,
      packed["w_dec1_top"], packed["w_dec1_bot"], packed["b_dec1"],
      packed["w_dec2_pad"], packed["b_dec2_pad"])

    mu = muls[:, :HIDDEN_DIM]
    logstd = muls[:, HIDDEN_DIM:]
    edge_score = score_pad[:, :INPUT_DIM]               # torch .squeeze() is a no-op here
    reconstructed_features = recon_pad[:, :INPUT_DIM]
    return edge_score, mu, logstd, reconstructed_features


if __name__ == "__main__":
    key = jax.random.PRNGKey(0)
    k_param, k_x, k_eps = jax.random.split(key, 3)

    # Small circular (ring) graph: 16 nodes, bidirectional ring edges -> E = 32.
    num_nodes = 16
    ring = jnp.arange(num_nodes, dtype=jnp.int32)
    nxt = (ring + 1) % num_nodes
    edge_index = jnp.stack(
        [jnp.concatenate([ring, nxt]), jnp.concatenate([nxt, ring])], axis=0
    )  # [2, 32]

    x = jax.random.normal(k_x, (num_nodes, INPUT_DIM), jnp.float32)
    eps = jax.random.normal(k_eps, (num_nodes, HIDDEN_DIM), jnp.float32)
    packed = pack_params(init_params(k_param))

    fwd = jax.jit(gvae_forward)
    edge_score, mu, logstd, recon = fwd(x, edge_index, packed, eps)
    jax.block_until_ready((edge_score, mu, logstd, recon))

    assert edge_score.shape == (2 * num_nodes, INPUT_DIM)
    assert mu.shape == (num_nodes, HIDDEN_DIM)
    assert logstd.shape == (num_nodes, HIDDEN_DIM)
    assert recon.shape == (2 * num_nodes, INPUT_DIM)
    assert bool(jnp.all(jnp.isfinite(edge_score)))
    assert bool(jnp.all((edge_score >= 0.0) & (edge_score <= 1.0)))
    print("KERNEL_OK")
</pallas_src>

<mosaic_0001>
module attributes {stable_mosaic.version = 11 : i64} {
  func.func private @main(%arg0: i32) attributes {dimension_semantics = [#tpu.dimension_semantics<core_parallel>], iteration_bounds = array<i64: 2>, tpu.core_type = #tpu.core_type<sc_scalar_subcore>, window_params = []} {
    return
  }
}

module attributes {stable_mosaic.version = 11 : i64} {
  func.func private @main(%arg0: i32) attributes {dimension_semantics = [#tpu.dimension_semantics<core_parallel>], iteration_bounds = array<i64: 2>, tpu.core_type = #tpu.core_type<sc_scalar_subcore>, window_params = []} {
    return
  }
}

module attributes {stable_mosaic.version = 11 : i64} {
  func.func @gvae_fused_kernel(%arg0: memref<16x16xbf16, #tpu.memory_space<vmem>>, %arg1: memref<16x28xbf16, #tpu.memory_space<vmem>>, %arg2: memref<32x1xi32, #tpu.memory_space<vmem>>, %arg3: memref<32x1xi32, #tpu.memory_space<vmem>>, %arg4: memref<28x64xf32, #tpu.memory_space<vmem>>, %arg5: memref<1x64xf32, #tpu.memory_space<vmem>>, %arg6: memref<64x128xf32, #tpu.memory_space<vmem>>, %arg7: memref<1x128xf32, #tpu.memory_space<vmem>>, %arg8: memref<16x64xf32, #tpu.memory_space<vmem>>, %arg9: memref<64x64xf32, #tpu.memory_space<vmem>>, %arg10: memref<64x64xf32, #tpu.memory_space<vmem>>, %arg11: memref<1x64xf32, #tpu.memory_space<vmem>>, %arg12: memref<64x128xf32, #tpu.memory_space<vmem>>, %arg13: memref<1x128xf32, #tpu.memory_space<vmem>>, %arg14: memref<16x128xf32, #tpu.memory_space<vmem>>, %arg15: memref<16x64xf32, #tpu.memory_space<vmem>>, %arg16: memref<32x128xf32, #tpu.memory_space<vmem>>, %arg17: memref<32x128xf32, #tpu.memory_space<vmem>>) attributes {dimension_semantics = [], scalar_prefetch = 0 : i64, scratch_operands = 0 : i64, tpu.core_type = #tpu.core_type<tc>} {
    %c0 = arith.constant 0 : index
    %c0_0 = arith.constant 0 : index
    %0 = vector.load %arg0[%c0, %c0_0] : memref<16x16xbf16, #tpu.memory_space<vmem>>, vector<16x16xbf16>
    %c0_1 = arith.constant 0 : index
    %c0_2 = arith.constant 0 : index
    %1 = vector.load %arg1[%c0_1, %c0_2] : memref<16x28xbf16, #tpu.memory_space<vmem>>, vector<16x28xbf16>
    %cst = arith.constant dense<0.000000e+00> : vector<16x28xf32>
    %2 = tpu.matmul %0, %1, %cst {dimension_numbers = #tpu.dot_dimension_numbers<[1], [0], [0], [1], [0, 0, 1, 1], [], []>} : vector<16x16xbf16>, vector<16x28xbf16>, vector<16x28xf32> -> vector<16x28xf32>
    %c0_3 = arith.constant 0 : index
    %c0_4 = arith.constant 0 : index
    %3 = vector.load %arg4[%c0_3, %c0_4] : memref<28x64xf32, #tpu.memory_space<vmem>>, vector<28x64xf32>
    %cst_5 = arith.constant dense<0.000000e+00> : vector<16x64xf32>
    %4 = tpu.matmul %2, %3, %cst_5 {dimension_numbers = #tpu.dot_dimension_numbers<[1], [0], [0], [1], [0, 0, 1, 1], [], []>} : vector<16x28xf32>, vector<28x64xf32>, vector<16x64xf32> -> vector<16x64xf32>
    %c0_6 = arith.constant 0 : index
    %c0_7 = arith.constant 0 : index
    %5 = vector.load %arg5[%c0_6, %c0_7] : memref<1x64xf32, #tpu.memory_space<vmem>>, vector<1x64xf32>
    %6 = vector.broadcast %5 : vector<1x64xf32> to vector<16x64xf32>
    %7 = arith.addf %4, %6 : vector<16x64xf32>
    %cst_8 = arith.constant 0.000000e+00 : f32
    %8 = vector.broadcast %cst_8 : f32 to vector<16x64xf32>
    %9 = arith.maximumf %7, %8 : vector<16x64xf32>
    %c0_9 = arith.constant 0 : index
    %c0_10 = arith.constant 0 : index
    %10 = vector.load %arg6[%c0_9, %c0_10] : memref<64x128xf32, #tpu.memory_space<vmem>>, vector<64x128xf32>
    %cst_11 = arith.constant dense<0.000000e+00> : vector<16x128xf32>
    %11 = tpu.matmul %9, %10, %cst_11 {dimension_numbers = #tpu.dot_dimension_numbers<[1], [0], [0], [1], [0, 0, 1, 1], [], []>} : vector<16x64xf32>, vector<64x128xf32>, vector<16x128xf32> -> vector<16x128xf32>
    %c0_12 = arith.constant 0 : index
    %c0_13 = arith.constant 0 : index
    %12 = vector.load %arg7[%c0_12, %c0_13] : memref<1x128xf32, #tpu.memory_space<vmem>>, vector<1x128xf32>
    %13 = vector.broadcast %12 : vector<1x128xf32> to vector<16x128xf32>
    %14 = arith.addf %11, %13 : vector<16x128xf32>
    %c0_14 = arith.constant 0 : index
    %c0_15 = arith.constant 0 : index
    %15 = vector.load %arg14[%c0_14, %c0_15] : memref<16x128xf32, #tpu.memory_space<vmem>>, vector<16x128xf32>
    tpu.vector_store %arg14[%c0_14, %c0_15], %14 {strides = array<i32>} : memref<16x128xf32, #tpu.memory_space<vmem>>, vector<16x128xf32>,
    %16 = vector.extract_strided_slice %14 {offsets = [0, 0], sizes = [16, 64], strides = [1, 1]} : vector<16x128xf32> to vector<16x64xf32>
    %17 = vector.extract_strided_slice %14 {offsets = [0, 64], sizes = [16, 64], strides = [1, 1]} : vector<16x128xf32> to vector<16x64xf32>
    %c0_16 = arith.constant 0 : index
    %c0_17 = arith.constant 0 : index
    %18 = vector.load %arg8[%c0_16, %c0_17] : memref<16x64xf32, #tpu.memory_space<vmem>>, vector<16x64xf32>
    %cst_18 = arith.constant 5.000000e-01 : f32
    %19 = vector.broadcast %cst_18 : f32 to vector<16x64xf32>
    %20 = arith.mulf %19, %17 : vector<16x64xf32>
    %21 = math.exp %20 : vector<16x64xf32>
    %22 = arith.mulf %18, %21 : vector<16x64xf32>
    %23 = arith.addf %16, %22 : vector<16x64xf32>
    %c0_19 = arith.constant 0 : index
    %c0_20 = arith.constant 0 : index
    %24 = vector.load %arg15[%c0_19, %c0_20] : memref<16x64xf32, #tpu.memory_space<vmem>>, vector<16x64xf32>
    tpu.vector_store %arg15[%c0_19, %c0_20], %23 {strides = array<i32>} : memref<16x64xf32, #tpu.memory_space<vmem>>, vector<16x64xf32>,
    %25 = tpu.iota {dimensions = array<i32: 1>} : vector<32x16xi32>
    %c0_21 = arith.constant 0 : index
    %c0_22 = arith.constant 0 : index
    %26 = vector.load %arg2[%c0_21, %c0_22] : memref<32x1xi32, #tpu.memory_space<vmem>>, vector<32x1xi32>
    %27 = vector.broadcast %26 : vector<32x1xi32> to vector<32x16xi32>
    %28 = arith.cmpi eq, %27, %25 : vector<32x16xi32>
    %cst_23 = arith.constant 1.000000e+00 : f32
    %cst_24 = arith.constant 0.000000e+00 : f32
    %29 = vector.broadcast %cst_23 : f32 to vector<32x16xf32>
    %30 = vector.broadcast %cst_24 : f32 to vector<32x16xf32>
    %31 = arith.select %28, %29, %30 : vector<32x16xi1>, vector<32x16xf32>
    %c0_25 = arith.constant 0 : index
    %c0_26 = arith.constant 0 : index
    %32 = vector.load %arg3[%c0_25, %c0_26] : memref<32x1xi32, #tpu.memory_space<vmem>>, vector<32x1xi32>
    %33 = vector.broadcast %32 : vector<32x1xi32> to vector<32x16xi32>
    %34 = arith.cmpi eq, %33, %25 : vector<32x16xi32>
    %cst_27 = arith.constant 1.000000e+00 : f32
    %cst_28 = arith.constant 0.000000e+00 : f32
    %35 = vector.broadcast %cst_27 : f32 to vector<32x16xf32>
    %36 = vector.broadcast %cst_28 : f32 to vector<32x16xf32>
    %37 = arith.select %34, %35, %36 : vector<32x16xi1>, vector<32x16xf32>
    %c0_29 = arith.constant 0 : index
    %c0_30 = arith.constant 0 : index
    %38 = vector.load %arg9[%c0_29, %c0_30] : memref<64x64xf32, #tpu.memory_space<vmem>>, vector<64x64xf32>
    %cst_31 = arith.constant dense<0.000000e+00> : vector<16x64xf32>
    %39 = tpu.matmul %23, %38, %cst_31 {dimension_numbers = #tpu.dot_dimension_numbers<[1], [0], [0], [1], [0, 0, 1, 1], [], []>} : vector<16x64xf32>, vector<64x64xf32>, vector<16x64xf32> -> vector<16x64xf32>
    %c0_32 = arith.constant 0 : index
    %c0_33 = arith.constant 0 : index
    %40 = vector.load %arg10[%c0_32, %c0_33] : memref<64x64xf32, #tpu.memory_space<vmem>>, vector<64x64xf32>
    %cst_34 = arith.constant dense<0.000000e+00> : vector<16x64xf32>
    %41 = tpu.matmul %23, %40, %cst_34 {dimension_numbers = #tpu.dot_dimension_numbers<[1], [0], [0], [1], [0, 0, 1, 1], [], []>} : vector<16x64xf32>, vector<64x64xf32>, vector<16x64xf32> -> vector<16x64xf32>
    %cst_35 = arith.constant dense<0.000000e+00> : vector<32x64xf32>
    %42 = tpu.matmul %31, %39, %cst_35 {dimension_numbers = #tpu.dot_dimension_numbers<[1], [0], [0], [1], [0, 0, 1, 1], [], []>} : vector<32x16xf32>, vector<16x64xf32>, vector<32x64xf32> -> vector<32x64xf32>
    %cst_36 = arith.constant dense<0.000000e+00> : vector<32x64xf32>
    %43 = tpu.matmul %37, %41, %cst_36 {dimension_numbers = #tpu.dot_dimension_numbers<[1], [0], [0], [1], [0, 0, 1, 1], [], []>} : vector<32x16xf32>, vector<16x64xf32>, vector<32x64xf32> -> vector<32x64xf32>
    %44 = arith.addf %42, %43 : vector<32x64xf32>
    %c0_37 = arith.constant 0 : index
    %c0_38 = arith.constant 0 : index
    %45 = vector.load %arg11[%c0_37, %c0_38] : memref<1x64xf32, #tpu.memory_space<vmem>>, vector<1x64xf32>
    %46 = vector.broadcast %45 : vector<1x64xf32> to vector<32x64xf32>
    %47 = arith.addf %44, %46 : vector<32x64xf32>
    %cst_39 = arith.constant 0.000000e+00 : f32
    %48 = vector.broadcast %cst_39 : f32 to vector<32x64xf32>
    %49 = arith.maximumf %47, %48 : vector<32x64xf32>
    %c0_40 = arith.constant 0 : index
    %c0_41 = arith.constant 0 : index
    %50 = vector.load %arg12[%c0_40, %c0_41] : memref<64x128xf32, #tpu.memory_space<vmem>>, vector<64x128xf32>
    %cst_42 = arith.constant dense<0.000000e+00> : vector<32x128xf32>
    %51 = tpu.matmul %49, %50, %cst_42 {dimension_numbers = #tpu.dot_dimension_numbers<[1], [0], [0], [1], [0, 0, 1, 1], [], []>} : vector<32x64xf32>, vector<64x128xf32>, vector<32x128xf32> -> vector<32x128xf32>
    %c0_43 = arith.constant 0 : index
    %c0_44 = arith.constant 0 : index
    %52 = vector.load %arg13[%c0_43, %c0_44] : memref<1x128xf32, #tpu.memory_space<vmem>>, vector<1x128xf32>
    %53 = vector.broadcast %52 : vector<1x128xf32> to vector<32x128xf32>
    %54 = arith.addf %51, %53 : vector<32x128xf32>
    %c0_45 = arith.constant 0 : index
    %c0_46 = arith.constant 0 : index
    %55 = vector.load %arg17[%c0_45, %c0_46] : memref<32x128xf32, #tpu.memory_space<vmem>>, vector<32x128xf32>
    tpu.vector_store %arg17[%c0_45, %c0_46], %54 {strides = array<i32>} : memref<32x128xf32, #tpu.memory_space<vmem>>, vector<32x128xf32>,
    %56 = arith.negf %54 : vector<32x128xf32>
    %57 = math.exp %56 : vector<32x128xf32>
    %cst_47 = arith.constant 1.000000e+00 : f32
    %58 = vector.broadcast %cst_47 : f32 to vector<32x128xf32>
    %59 = arith.addf %58, %57 : vector<32x128xf32>
    %60 = arith.divf %58, %59 : vector<32x128xf32>
    %c0_48 = arith.constant 0 : index
    %c0_49 = arith.constant 0 : index
    %61 = vector.load %arg16[%c0_48, %c0_49] : memref<32x128xf32, #tpu.memory_space<vmem>>, vector<32x128xf32>
    tpu.vector_store %arg16[%c0_48, %c0_49], %60 {strides = array<i32>} : memref<32x128xf32, #tpu.memory_space<vmem>>, vector<32x128xf32>,
    return
  }
}

</mosaic_0001>

<bundles_post_ra>
// kernel: gvae_forward.1
= control target key start
LH: loop header
LB: loop body
LE: loop exit
PB: predicated region body
PF: predicated region fallthrough
CT: control target
= control target key end

     0   :  { %s1710_s0 = inlined_call_operand.vmem [shape: bf16[16,16], index: 0, kind: input, shape index: {}]   ;;  %s1711_s1 = inlined_call_operand.vmem [shape: bf16[16,28], index: 1, kind: input, shape index: {}]   ;;  %s1712_s2 = inlined_call_operand.vmem [shape: s32[32,1], index: 2, kind: input, shape index: {}]   ;;  %s1713_s3 = inlined_call_operand.vmem [shape: s32[32,1], index: 3, kind: input, shape index: {}]   ;;  %s1714_s4 = inlined_call_operand.vmem [shape: f32[28,64], index: 4, kind: input, shape index: {}]   ;;  %s1715_s5 = inlined_call_operand.vmem [shape: f32[1,64], index: 5, kind: input, shape index: {}]   ;;  %s1716_s6 = inlined_call_operand.vmem [shape: f32[64,128], index: 6, kind: input, shape index: {}]   ;;  %s1717_s7 = inlined_call_operand.vmem [shape: f32[1,128], index: 7, kind: input, shape index: {}]   ;;  %s1718_s8 = inlined_call_operand.vmem [shape: f32[16,64], index: 8, kind: input, shape index: {}]   ;;  %s1719_s9 = inlined_call_operand.vmem [shape: f32[64,64], index: 9, kind: input, shape index: {}]   ;;  %s1720_s10 = inlined_call_operand.vmem [shape: f32[64,64], index: 10, kind: input, shape index: {}]   ;;  %s1721_s11 = inlined_call_operand.vmem [shape: f32[1,64], index: 11, kind: input, shape index: {}]   ;;  %s1722_s12 = inlined_call_operand.vmem [shape: f32[64,128], index: 12, kind: input, shape index: {}]   ;;  %s1723_s13 = inlined_call_operand.vmem [shape: f32[1,128], index: 13, kind: input, shape index: {}]   ;;  %s1724_s14 = inlined_call_operand.vmem [shape: f32[16,128], index: 14, kind: output, shape index: {0}]   ;;  %s1725_s15 = inlined_call_operand.hbm [shape: f32[16,64], index: 15, kind: output, shape index: {1}]   ;;  %s1726_s16 = inlined_call_operand.hbm [shape: f32[32,128], index: 16, kind: output, shape index: {2}]   ;;  %s1727_s17 = inlined_call_operand.hbm [shape: f32[32,128], index: 17, kind: output, shape index: {3}]  }
   0x1   :  { %1728 = sst [smem:[#allocation9_spill]] %s1710_s0 }
   0x2   :  { %1729 = sst [smem:[#allocation10_spill]] %s1711_s1 }
   0x3   :  { %23 = vsyncpa [#allocation3], 0  ;;  %s1730_s26 = sld [smem:[#allocation10_spill]]  ;;  %v1360_v1 = vmov 0.0   ;;  %s1731_s29 = sld [smem:[#allocation9_spill]]  ;;  %vm1361_vm0 = vmmov 0  }
   0x4   :  { %1054 = vmatprep.subr.bf16.mxu1 %v1360_v1  ;;  %1056 = vmatprep.mubr.msk.bf16.mxu1 %vm1361_vm0, %v1360_v1  ;;  %vm69_vm1 = vcmask 130048   ;;  %v114_v3 = vld [vmem:[%s1714_s4] sm:$0xff]  ;;  %v115_v4 = vld [vmem:[%s1714_s4 + $0x8] sm:$0xff]  ;;  %v116_v5 = vld [vmem:[%s1714_s4 + $0x10] sm:$0xff]  ;;  %vm132_vm2 = vcmask 1043456   ;;  %vm1362_vm3 = vmmov 1  }
   0x5   :  { %v1170_v6 = vpack.c.bf16 %v115_v4, %v114_v3  ;;  %v117_v7 = vld [vmem:[%s1714_s4 + $0x18] sm:$0xf]  ;;  %vm1175_vm4 = vmpackc.low %vm132_vm2, %vm1362_vm3 }
   0x6   :  { %v1174_v8 = vpack.c.bf16 %v117_v7, %v116_v5 }
   0x9   :  { %v1268_v0 = vld [vmem:[%s1730_s26] sm:$0xff]  }
   0xa   :  { %v1269_v2 = vld [vmem:[%s1731_s29] sm:$0xff]   ;;  %1055 = vmatpush3.bf16.msra.mxu1 %v1268_v0 }
   0xb   :  { %24 = vsyncpa [#allocation5], 0  ;;  %1171 = vmatprep.subr.bf16.mxu1 %v1170_v6  ;;  %v213_v9 = vld [vmem:[%s1716_s6] sm:$0xff]  ;;  %v214_v10 = vld [vmem:[%s1716_s6 + $0x8] sm:$0xff]  ;;  %vm125_vm5 = vcmask 228352   ;;  %vm228_vm6 = vcmask 523264  }
   0xc   :  { %v215_v11 = vld [vmem:[%s1716_s6 + $0x10] sm:$0xff]  ;;  %v1180_v12 = vpack.c.bf16 %v214_v10, %v213_v9  ;;  %v216_v13 = vld [vmem:[%s1716_s6 + $0x18] sm:$0xff]  ;;  %v217_v15 = vld [vmem:[%s1716_s6 + $0x20] sm:$0xff]  ;;  %v1363_v3 = vmov 0  }
   0xd   :  { %1057 = vmatmul.mubr.msk.bf16.vlgmr.msra.gmra.mrb[0].mxu1 %vm69_vm1, %v1269_v2  ;;  %v1184_v14 = vpack.c.bf16 %v216_v13, %v215_v11  ;;  %v218_v16 = vld [vmem:[%s1716_s6 + $0x28] sm:$0xff]  ;;  %v219_v22 = vld [vmem:[%s1716_s6 + $0x30] sm:$0xff]  ;;  %v220_v23 = vld [vmem:[%s1716_s6 + $0x38] sm:$0xff]  ;;  %1266 = vset.pattern.permute.xlu1 %v1363_v3 }
   0xe   :  { %1173 = vmatpush3.bf16.msra.mxu1 %v1170_v6  ;;  %1181 = vmatprep.subr.bf16.mxu0 %v1180_v12  ;;  %v1188_v17 = vpack.c.bf16 %v218_v16, %v217_v15  ;;  %v1192_v24 = vpack.c.bf16 %v220_v23, %v219_v22  ;;  %v963_v25 = vld [vmem:[%s1715_s5] ss:$0 sm:$0xff]  ;;  %v385_v33 = vld [vmem:[%s1719_s9 + $0x8] sm:$0xff]  ;;  %v386_v37 = vld [vmem:[%s1719_s9 + $0x10] sm:$0xff] }
   0xf   :  { %1176 = vmatprep.subr.msk.bf16.mxu1 %vm1175_vm4, %v1174_v8  ;;  %1183 = vmatpush3.bf16.msra.mxu0 %v1180_v12  ;;  %v384_v32 = vld [vmem:[%s1719_s9] sm:$0xff]  ;;  %v474_v36 = vld [vmem:[%s1720_s10 + $0x8] sm:$0xff]  ;;  %v387_v38 = vld [vmem:[%s1719_s9 + $0x18] sm:$0xff] }
  0x10   :  { %1185 = vmatprep.subr.bf16.mxu0 %v1184_v14  ;;  %v473_v34 = vld [vmem:[%s1720_s10] sm:$0xff]  ;;  %v1196_v35 = vpack.c.bf16 %v385_v33, %v384_v32  ;;  %v1200_v40 = vpack.c.bf16 %v387_v38, %v386_v37  ;;  %v475_v41 = vld [vmem:[%s1720_s10 + $0x10] sm:$0xff]  ;;  %v476_v42 = vld [vmem:[%s1720_s10 + $0x18] sm:$0xff]  ;;  %1267 = vset.pattern.permute.xlu0 %v1363_v3 }
  0x11   :  { %v1212_v39 = vpack.c.bf16 %v474_v36, %v473_v34  ;;  %v1216_v43 = vpack.c.bf16 %v476_v42, %v475_v41  ;;  %v967_v44 = vld [vmem:[%s1717_s7] ss:$0 sm:$0xff]  ;;  %v389_v50 = vld [vmem:[%s1719_s9 + $0x28] sm:$0xff]  ;;  %v390_v58 = vld [vmem:[%s1719_s9 + $0x30] sm:$0xff] }
  0x12   :  { %1179 = vmatpush3.bf16.msk.msra.mxu1 %vm1175_vm4, %v1174_v8  ;;  %v388_v49 = vld [vmem:[%s1719_s9 + $0x20] sm:$0xff]  ;;  %v478_v55 = vld [vmem:[%s1720_s10 + $0x28] sm:$0xff]  ;;  %v391_v59 = vld [vmem:[%s1719_s9 + $0x38] sm:$0xff] }
  0x13   :  { %1187 = vmatpush3.bf16.msra.mxu0 %v1184_v14  ;;  %1197 = vmatprep.subr.bf16.mxu1 %v1196_v35  ;;  %v477_v51 = vld [vmem:[%s1720_s10 + $0x20] sm:$0xff]  ;;  %v1204_v54 = vpack.c.bf16 %v389_v50, %v388_v49  ;;  %v479_v60 = vld [vmem:[%s1720_s10 + $0x30] sm:$0xff]  ;;  %v1208_v62 = vpack.c.bf16 %v391_v59, %v390_v58  ;;  %v480_v63 = vld [vmem:[%s1720_s10 + $0x38] sm:$0xff]  ;;  %s1364_s10 = smov 64  }
  0x14   :  { %1189 = vmatprep.subr.bf16.mxu0 %v1188_v17  ;;  %v1220_v56 = vpack.c.bf16 %v478_v55, %v477_v51  ;;  %v1224_v0 = vpack.c.bf16 %v480_v63, %v479_v60  ;;  %v360_v2 = vld [vmem:[%s1713_s3] sm:$0xff]  ;;  %v361_v4 = vld [vmem:[%s1713_s3 + $0x8] sm:$0xff]  ;;  %v363_v6 = vld [vmem:[%s1713_s3 + $0x18] sm:$0xff] }
  0x15   :  { %365 = vperm.xlu1 %1266, %v360_v2   ;;  %v362_v8 = vld [vmem:[%s1713_s3 + $0x10] sm:$0xff]  ;;  %v336_v9 = vld [vmem:[%s1712_s2] sm:$0xff]  ;;  %v337_v10 = vld [vmem:[%s1712_s2 + $0x8] sm:$0xff] }
  0x16   :  { %v338_v11 = vld [vmem:[%s1712_s2 + $0x10] sm:$0xff]  ;;  %v339_v12 = vld [vmem:[%s1712_s2 + $0x18] sm:$0xff]  ;;  %v312_v13 = vld [vmem:[%s1718_s8] sm:$0xff] }
  0x17   :  { %1191 = vmatpush3.bf16.msra.mxu0 %v1188_v17  ;;  %v313_v16 = vld [vmem:[%s1718_s8 + $0x8] sm:$0xff]  ;;  %v772_v55 = vld [vmem:[%s1722_s12 + $0x38] sm:$0xff] }
  0x18   :  { %1193 = vmatprep.subr.bf16.mxu0 %v1192_v24  ;;  %v770_v32 = vld [vmem:[%s1722_s12 + $0x28] sm:$0xff] }
  0x19   :  { %368 = vperm.xlu1 %1266, %v361_v4  }
  0x1b   :  { %1195 = vmatpush3.bf16.msra.mxu0 %v1192_v24 }
  0x1c   :  { %1213 = vmatprep.subr.bf16.mxu0 %v1212_v39 }
  0x1d   :  { %374 = vperm.xlu1 %1266, %v363_v6  }
  0x21   :  { %341 = vperm.xlu1 %1266, %v336_v9  }
  0x25   :  { %347 = vperm.xlu1 %1266, %v338_v11  }
  0x94   :  { %v366_v23 = vpop.permute.xlu1 %365 }
  0x98   :  { %v369_v34 = vpop.permute.xlu1 %368 }
  0xe0   :  { %v107_v18 = vpop.f32.mrb[0].mxu1 }
  0xe1   :  { %v1058_v19 = vpop.f32.mrb[1].mxu1  ;;  %1068 = vmatprep.mubr.msk.f32.mxu1 %vm125_vm5, %v107_v18  ;;  %v334_v18 = vlaneseq }
  0xe2   :  { %v110_v20 = vpop.f32.mrb[2].mxu1 }
  0xe3   :  { %v1059_v21 = vpop.f32.mrb[3].mxu1  ;;  %1069 = vmatmul.mubr.msk.f32.vlgmr.msra.gmra.mrb[4].mxu1 %vm125_vm5, %v110_v20  ;;  %v335_v22 = vand.u32 127, %v334_v18 }
  0xe4   :  { %1199 = vmatpush3.bf16.msra.mxu1 %v1196_v35  ;;  %v375_v35 = vpop.permute.xlu1 %374 }
  0xe5   :  { %1201 = vmatprep.subr.bf16.mxu1 %v1200_v40  ;;  %vm376_vm7 = vcmp.eq.s32.totalorder %v366_v23, %v335_v22  ;;  %vm377_vm9 = vcmp.eq.s32.totalorder %v369_v34, %v335_v22  ;;  %vm379_vm10 = vcmp.eq.s32.totalorder %v375_v35, %v335_v22 }
  0xe6   :  { %v380_v24 = vsel %vm376_vm7, 1.0, %v1360_v1 }
  0xe8   :  { %1203 = vmatpush3.bf16.msra.mxu1 %v1200_v40 }
  0xe9   :  { %1205 = vmatprep.subr.bf16.mxu1 %v1204_v54 }
  0xec   :  { %1207 = vmatpush3.bf16.msra.mxu1 %v1204_v54  ;;  %v771_v54 = vld [vmem:[%s1722_s12 + $0x30] sm:$0xff] }
  0xed   :  { %1209 = vmatprep.subr.bf16.mxu1 %v1208_v62 }
  0xf0   :  { %1211 = vmatpush3.bf16.msra.mxu1 %v1208_v62 }
 0x1b6   :  { %v1070_v26 = vpop.f32.mrb[4].mxu1 }
 0x1b7   :  { %v208_v27 = vadd.f32 %v1070_v26, %v963_v25  ;;  %v202_v28 = vpop.f32.mrb[5].mxu1  ;;  %v766_v26 = vld [vmem:[%s1722_s12 + $0x8] sm:$0xff] }
 0x1b8   :  { %v203_v29 = vadd.f32 %v963_v25, %v202_v28  ;;  %v765_v25 = vld [vmem:[%s1722_s12] sm:$0xff] }
 0x1b9   :  { %v212_v31 = vmax.f32 %v208_v27, 0.0  ;;  %v767_v27 = vld [vmem:[%s1722_s12 + $0x10] sm:$0xff]  ;;  %v1236_v28 = vpack.c.bf16 %v766_v26, %v765_v25 }
 0x1ba   :  { %v211_v30 = vmax.f32 %v203_v29, 0.0  ;;  %v768_v29 = vld [vmem:[%s1722_s12 + $0x18] sm:$0xff] }
 0x1bc   :  { %1087 = vmatprep.mubr.msk.f32.mxu0 %vm228_vm6, %v211_v30  ;;  %v1240_v30 = vpack.c.bf16 %v768_v29, %v767_v27 }
 0x1bd   :  { %1088 = vmatmul.mubr.msk.f32.vlgmr.msra.gmra.mrb[0].mxu0 %vm228_vm6, %v212_v31  ;;  %v769_v31 = vld [vmem:[%s1722_s12 + $0x20] sm:$0xff] }
 0x1be   :  { %1215 = vmatpush3.bf16.msra.mxu0 %v1212_v39  ;;  %v1244_v33 = vpack.c.bf16 %v770_v32, %v769_v31 }
 0x1bf   :  { %1217 = vmatprep.subr.bf16.mxu0 %v1216_v43 }
 0x1c2   :  { %1219 = vmatpush3.bf16.msra.mxu0 %v1216_v43  ;;  %v342_v43 = vpop.permute.xlu1 %341 }
 0x1c3   :  { %1221 = vmatprep.subr.bf16.mxu0 %v1220_v56  ;;  %vm352_vm11 = vcmp.eq.s32.totalorder %v342_v43, %v335_v22 }
 0x1c4   :  { %v356_v49 = vsel %vm352_vm11, 1.0, %v1360_v1 }
 0x1c6   :  { %1223 = vmatpush3.bf16.msra.mxu0 %v1220_v56  ;;  %v1248_v56 = vpack.c.bf16 %v772_v55, %v771_v54 }
 0x1c7   :  { %1225 = vmatprep.subr.bf16.mxu0 %v1224_v0 }
 0x1ca   :  { %1227 = vmatpush3.bf16.msra.mxu0 %v1224_v0 }
 0x1cb   :  { %1237 = vmatprep.subr.bf16.mxu0 %v1236_v28 }
 0x290   :  { %v1089_v45 = vpop.f32.mrb[0].mxu0 }
 0x291   :  { %v1537_v46 = vadd.f32 %v1089_v45, %v967_v44  ;;  %v301_v47 = vpop.f32.mrb[1].mxu0  ;;  %v381_v45 = vsel %vm377_vm9, 1.0, %v1360_v1 }
 0x292   :  { %v302_v48 = vadd.f32 %v967_v44, %v301_v47  ;;  %v348_v47 = vpop.permute.xlu1 %347 }
 0x293   :  { %311 = vst [vmem:[%s1724_s14 + $0x8] sm:$0xff] %v1537_v46  ;;  %v315_v52 = vmul.f32 0.5, %v1537_v46  ;;  %vm354_vm13 = vcmp.eq.s32.totalorder %v348_v47, %v335_v22 }
 0x294   :  { %310 = vst [vmem:[%s1724_s14] sm:$0xff] %v302_v48  ;;  %v314_v53 = vmul.f32 0.5, %v302_v48 }
 0x295   :  { %v318_v61 = vmul.f32 1.442695, %v315_v52  ;;  %v358_v52 = vsel %vm354_vm13, 1.0, %v1360_v1 }
 0x296   :  { %v316_v57 = vmul.f32 1.442695, %v314_v53 }
 0x298   :  { %1270 = vpow2.f32 %v316_v57  ;;  %v982_v57 = vld [vmem:[%s1721_s11] ss:$0 sm:$0xff]  ;;  %s1365_s11 = smov [#allocation2]  }
 0x299   :  { %1272 = vpow2.f32 %v318_v61  ;;  %s916_s12 = sshll.u32 %s1365_s11, 4  ;;  %s917_s12 = int_to_ptr.vmem [resolvable:$true] %s916_s12 }
 0x29a   :  { %s1290_s19 = scalar_lea.vmem %s917_s12, 256  ;;  %p1295_p1 = scmp.lt.s32.totalorder %s917_s12, %s917_s12 }
 0x29b   :  { %p1291_p0 = scmp.ne.s32.totalorder %s917_s12, %s1290_s19  ;;  %p1296_p2 = scmp.lt.s32.totalorder %s1290_s19, %s1290_s19 }
 0x29d   :  { %p1297_p3 = por %p1296_p2, %p1295_p1 }
 0x29f   :  { %p1298_p4 = pnand %p1297_p3, %p1291_p0 }
 0x2a2   :  { %v1271_v5 = vpop.eup %1270 }
 0x2a3   :  { %322 = vrot.lane.b32.xlu0 %v1271_v5, %s1364_s10  ;;  %v1273_v7 = vpop.eup %1272 }
 0x2a7   :  { %324 = vrot.lane.b32.xlu0 %v1273_v7, %s1364_s10 }
 0x2ab   :  { %371 = vperm.xlu0 %1267, %v362_v8  }
 0x2af   :  { %344 = vperm.xlu0 %1267, %v337_v10  }
 0x2b3   :  { %350 = vperm.xlu0 %1267, %v339_v12  }
 0x315   :  { %v323_v14 = vpop.permute.xlu0 %322 }
 0x316   :  { %v328_v15 = vmul.f32 %v323_v14, %v312_v13 }
 0x318   :  { %v330_v17 = vadd.f32 %v328_v15, %v302_v48  ;;  %v383_v48 = vsel %vm379_vm10, 1.0, %v1360_v1 }
 0x319   :  { %v325_v19 = vpop.permute.xlu0 %324 }
 0x31a   :  { %332 = vst.msk [vmem:[#allocation2] sm:$0xff] %vm228_vm6, %v330_v17  ;;  %v329_v20 = vmul.f32 %v325_v19, %v313_v16  ;;  %1106 = vmatprep.mubr.msk.f32.mxu1 %vm228_vm6, %v330_v17  ;;  %1125 = vmatprep.mubr.msk.f32.mxu0 %vm228_vm6, %v330_v17 }
 0x31c   :  { %v331_v21 = vadd.f32 %v329_v20, %v1537_v46 }
 0x31e   :  { %333 = vst.msk [vmem:[#allocation2 + $0x8] sm:$0xff] %vm228_vm6, %v331_v21  ;;  %1107 = vmatmul.mubr.msk.f32.vlgmr.msra.gmra.mrb[6].mxu1 %vm228_vm6, %v331_v21  ;;  %1126 = vmatmul.mubr.msk.f32.vlgmr.msra.gmra.mrb[2].mxu0 %vm228_vm6, %v331_v21 }
 0x31f   :  { %1132 = vmatprep.mubr.msk.f32.mxu1 %vm69_vm1, %v380_v24  ;;  %1239 = vmatpush3.bf16.msra.mxu0 %v1236_v28 }
 0x320   :  { %1241 = vmatprep.subr.bf16.mxu0 %v1240_v30 }
 0x323   :  { %1243 = vmatpush3.bf16.msra.mxu0 %v1240_v30 }
 0x324   :  { %1245 = vmatprep.subr.bf16.mxu0 %v1244_v33 }
 0x327   :  { %1247 = vmatpush3.bf16.msra.mxu0 %v1244_v33 }
 0x328   :  { %1249 = vmatprep.subr.bf16.mxu0 %v1248_v56 }
 0x32a   :  { %v372_v36 = vpop.permute.xlu0 %371 }
 0x32b   :  { %vm378_vm8 = vcmp.eq.s32.totalorder %v372_v36, %v335_v22  ;;  %1251 = vmatpush3.bf16.msra.mxu0 %v1248_v56 }
 0x32c   :  { %v382_v44 = vsel %vm378_vm8, 1.0, %v1360_v1 }
 0x32e   :  { %v345_v46 = vpop.permute.xlu0 %344 }
 0x32f   :  { %vm353_vm12 = vcmp.eq.s32.totalorder %v345_v46, %v335_v22 }
 0x330   :  { %v357_v51 = vsel %vm353_vm12, 1.0, %v1360_v1 }
 0x332   :  { %v351_v50 = vpop.permute.xlu0 %350 }
 0x333   :  { %vm355_vm14 = vcmp.eq.s32.totalorder %v351_v50, %v335_v22 }
 0x334   :  { %v359_v53 = vsel %vm355_vm14, 1.0, %v1360_v1 }
 0x3f1   :  { %v1108_v37 = vpop.f32.mrb[6].mxu1  ;;  %v1127_v38 = vpop.f32.mrb[2].mxu0 }
 0x3f2   :  { %v464_v39 = vpop.f32.mrb[7].mxu1  ;;  %v547_v40 = vpop.f32.mrb[3].mxu0 }
 0x3f3   :  { %v1232_v41 = vpack.c.bf16 %v1108_v37, %v464_v39  ;;  %v1228_v42 = vpack.c.bf16 %v1127_v38, %v547_v40 }
 0x3f5   :  { %1229 = vmatprep.subr.bf16.mxu1 %v1228_v42 }
 0x3f6   :  { %1231 = vmatpush3.bf16.msra.mxu1 %v1228_v42 }
 0x3f7   :  { %1233 = vmatprep.subr.bf16.mxu1 %v1232_v41 }
 0x3f9   :  { %1133 = vmatmul.mubr.msk.f32.vlgmr.msra.gmra.mrb[8].mxu1 %vm69_vm1, %v381_v45 }
 0x3fa   :  { %1235 = vmatpush3.bf16.msra.mxu1 %v1232_v41  ;;  %1135 = vmatprep.mubr.msk.f32.mxu1 %vm69_vm1, %v382_v44 }
 0x3fd   :  { %1136 = vmatmul.mubr.msk.f32.gmra.mrb[10].mxu1 %vm69_vm1, %v383_v48 }
 0x3fe   :  { %1142 = vmatprep.mubr.msk.f32.mxu1 %vm69_vm1, %v356_v49 }
 0x401   :  { %1143 = vmatmul.mubr.msk.f32.vlgmr.msra.gmra.mrb[8].mxu1 %vm69_vm1, %v357_v51 }
 0x402   :  { %1145 = vmatprep.mubr.msk.f32.mxu1 %vm69_vm1, %v358_v52 }
 0x405   :  { %1146 = vmatmul.mubr.msk.f32.gmra.mrb[10].mxu1 %vm69_vm1, %v359_v53 }
 0x4d4   :  { %v1144_v58 = vpop.f32.mrb[8].mxu1 }
 0x4d5   :  { %v758_v59 = vadd.f32 %v1144_v58, %v982_v57  ;;  %v731_v1 = vpop.f32.mrb[9].mxu1 }
 0x4d6   :  { %v757_v60 = vadd.f32 %v982_v57, %v731_v1 }
 0x4d7   :  { %v762_v63 = vmax.f32 %v758_v59, 0.0 }
 0x4d8   :  { %v761_v61 = vmax.f32 %v757_v60, 0.0  ;;  %v1147_v62 = vpop.f32.mrb[10].mxu1 }
 0x4d9   :  { %v760_v0 = vadd.f32 %v1147_v62, %v982_v57  ;;  %v741_v2 = vpop.f32.mrb[11].mxu1 }
 0x4da   :  { %v759_v3 = vadd.f32 %v982_v57, %v741_v2  ;;  %1164 = vmatprep.mubr.msk.f32.mxu0 %vm228_vm6, %v761_v61 }
 0x4db   :  { %1165 = vmatmul.mubr.msk.f32.vlgmr.msra.gmra.mrb[4].mxu0 %vm228_vm6, %v762_v63  ;;  %v764_v5 = vmax.f32 %v760_v0, 0.0 }
 0x4dc   :  { %v763_v4 = vmax.f32 %v759_v3, 0.0 }
 0x4de   :  { %1167 = vmatprep.mubr.msk.f32.mxu0 %vm228_vm6, %v763_v4 }
 0x4df   :  { %1168 = vmatmul.mubr.msk.f32.gmra.mrb[6].mxu0 %vm228_vm6, %v764_v5 }
 0x4e0   :  { %1301 = shalt.err (!%p1298_p4)
}
 0x4e1   :  { %s1302_s3 = scalar_lea.hbm %s1725_s15, 256 }
 0x4e2   :  { %p1303_p5 = scmp.ne.s32.totalorder %s1725_s15, %s1302_s3  ;;  %p1306_p6 = scmp.lt.u32.totalorder %s1302_s3, %s1725_s15 }
 0x4e4   :  { %p1308_p7 = pnand %p1306_p6, %p1303_p5 }
 0x4e6   :  { %1311 = shalt.err (!%p1308_p7)
}
 0x4e7   :  { %s1366_s8 = smov 128   ;;  %s1367_s23 = smov 8   ;;  %v983_v6 = vld [vmem:[%s1723_s13] ss:$0 sm:$0xff] }
 0x4e8   :  { %922 = dma.vmem_to_hbm [thread:$0]  %s917_s12, 256, %s1725_s15, [#allocation3], %s1366_s8, %s1366_s8, %s1367_s23  }
 0x4e9   :  { %s1368_s13 = smov [#allocation4]   ;;  %s1369_s26 = smov [#allocation6]  }
 0x4ea   :  { %s928_s15 = sshll.u32 %s1368_s13, 4  ;;  %s940_s10 = sshll.u32 %s1369_s26, 4  ;;  %s929_s15 = int_to_ptr.vmem [resolvable:$true] %s928_s15  ;;  %s1673_s10 = int_to_ptr.vmem [resolvable:$true] %s940_s10 }
 0x4eb   :  { %s1312_s27 = scalar_lea.vmem %s929_s15, 512  ;;  %p1317_p9 = scmp.lt.s32.totalorder %s929_s15, %s929_s15 }
 0x4ec   :  { %p1313_p8 = scmp.ne.s32.totalorder %s929_s15, %s1312_s27  ;;  %p1318_p10 = scmp.lt.s32.totalorder %s1312_s27, %s1312_s27 }
 0x4ee   :  { %p1319_p11 = por %p1318_p10, %p1317_p9 }
 0x4f0   :  { %p1320_p12 = pnand %p1319_p11, %p1313_p8 }
 0x5ae   :  { %v1166_v7 = vpop.f32.mrb[4].mxu0 }
 0x5af   :  { %v864_v8 = vadd.f32 %v1166_v7, %v983_v6  ;;  %v858_v9 = vpop.f32.mrb[5].mxu0 }
 0x5b0   :  { %v859_v10 = vadd.f32 %v983_v6, %v858_v9 }
 0x5b1   :  { %878 = vst [vmem:[#allocation6 + $0x8] sm:$0xff] %v864_v8  ;;  %v989_v11 = vmul.f32 -1.442695, %v864_v8 }
 0x5b2   :  { %877 = vst [vmem:[#allocation6] sm:$0xff] %v859_v10  ;;  %v988_v12 = vmul.f32 -1.442695, %v859_v10  ;;  %v1169_v13 = vpop.f32.mrb[6].mxu0 }
 0x5b3   :  { %1274 = vpow2.f32 %v989_v11  ;;  %v874_v14 = vadd.f32 %v1169_v13, %v983_v6  ;;  %v868_v15 = vpop.f32.mrb[7].mxu0 }
 0x5b4   :  { %1276 = vpow2.f32 %v988_v12  ;;  %v869_v16 = vadd.f32 %v983_v6, %v868_v15 }
 0x5b5   :  { %880 = vst [vmem:[#allocation6 + $0x18] sm:$0xff] %v874_v14  ;;  %v991_v17 = vmul.f32 -1.442695, %v874_v14 }
 0x5b6   :  { %879 = vst [vmem:[#allocation6 + $0x10] sm:$0xff] %v869_v16  ;;  %v990_v18 = vmul.f32 -1.442695, %v869_v16 }
 0x5b7   :  { %1278 = vpow2.f32 %v991_v17 }
 0x5b8   :  { %1280 = vpow2.f32 %v990_v18 }
 0x5bd   :  { %v1275_v19 = vpop.eup %1274 }
 0x5be   :  { %v1277_v20 = vpop.eup %1276  ;;  %v894_v21 = vadd.f32 1.0, %v1275_v19 }
 0x5bf   :  { %v893_v22 = vadd.f32 1.0, %v1277_v20 }
 0x5c0   :  { %1282 = vrcp.f32 %v894_v21 }
 0x5c1   :  { %v1279_v23 = vpop.eup %1278  ;;  %1284 = vrcp.f32 %v893_v22 }
 0x5c2   :  { %v1281_v24 = vpop.eup %1280  ;;  %v896_v25 = vadd.f32 1.0, %v1279_v23 }
 0x5c3   :  { %v895_v26 = vadd.f32 1.0, %v1281_v24 }
 0x5c4   :  { %1286 = vrcp.f32 %v896_v25 }
 0x5c5   :  { %1288 = vrcp.f32 %v895_v26 }
 0x5ca   :  { %v1283_v27 = vpop.eup %1282 }
 0x5cb   :  { %v1285_v28 = vpop.eup %1284  ;;  %906 = vst [vmem:[#allocation4 + $0x8] sm:$0xff] %v1283_v27 }
 0x5cc   :  { %905 = vst [vmem:[#allocation4] sm:$0xff] %v1285_v28 }
 0x5ce   :  { %v1287_v29 = vpop.eup %1286 }
 0x5cf   :  { %v1289_v30 = vpop.eup %1288  ;;  %908 = vst [vmem:[#allocation4 + $0x18] sm:$0xff] %v1287_v29 }
 0x5d0   :  { %907 = vst [vmem:[#allocation4 + $0x10] sm:$0xff] %v1289_v30 }
 0x5d1   :  { %1323 = shalt.err (!%p1320_p12)
}
 0x5d2   :  { %s1324_s28 = scalar_lea.hbm %s1726_s16, 512 }
 0x5d3   :  { %p1325_p13 = scmp.ne.s32.totalorder %s1726_s16, %s1324_s28  ;;  %p1328_p0 = scmp.lt.u32.totalorder %s1324_s28, %s1726_s16 }
 0x5d5   :  { %p1330_p1 = pnand %p1328_p0, %p1325_p13 }
 0x5d7   :  { %1333 = shalt.err (!%p1330_p1)
}
 0x5d8   :  { %934 = dma.vmem_to_hbm [thread:$0]  %s929_s15, 512, %s1726_s16, [#allocation5], %s1366_s8, %s1366_s8, %s1367_s23  }
 0x5d9   :  { %s1334_s12 = scalar_lea.vmem %s1673_s10, 512  ;;  %p1339_p3 = scmp.lt.s32.totalorder %s1673_s10, %s1673_s10 }
 0x5da   :  { %p1335_p2 = scmp.ne.s32.totalorder %s1673_s10, %s1334_s12  ;;  %p1340_p4 = scmp.lt.s32.totalorder %s1334_s12, %s1334_s12 }
 0x5dc   :  { %p1341_p5 = por %p1340_p4, %p1339_p3 }
 0x5de   :  { %p1342_p6 = pnand %p1341_p5, %p1335_p2 }
 0x5e0   :  { %1345 = shalt.err (!%p1342_p6)
}
 0x5e1   :  { %s1346_s20 = scalar_lea.hbm %s1727_s17, 512 }
 0x5e2   :  { %p1347_p7 = scmp.ne.s32.totalorder %s1727_s17, %s1346_s20  ;;  %p1350_p8 = scmp.lt.u32.totalorder %s1346_s20, %s1727_s17 }
 0x5e4   :  { %p1352_p9 = pnand %p1350_p8, %p1347_p7 }
 0x5e6   :  { %1355 = shalt.err (!%p1352_p9)
}
 0x5e7   :  { %946 = dma.vmem_to_hbm [thread:$0]  %s1673_s10, 512, %s1727_s17, [#allocation5], %s1366_s8, %s1366_s8, %s1367_s23  }
 0x5e8   :  { %1356 = dma.done.wait [#allocation3], 256  }
 0x5e9   :  { %1357 = vsyncadd [#allocation3], 4294967040 }
 0x5ea   :  { %1358 = dma.done.wait [#allocation5], 1024  }
 0x5eb   :  { %1359 = vsyncadd [#allocation5], 4294966272 }
 0x5ec   :  { %958 = vsyncpa [#allocation3], 1 }
 0x5ed   :  { %959 = vsyncpa [#allocation5], 1 }

</bundles_post_ra>
